<compile_context>
chip_gen: v7x
topology: tpu7x:2x2x1
jax: 0.10.0
libtpu: 0.0.40
codegen_flags: <defaults>
</compile_context>

<pallas_src>
from dataclasses import dataclass

import jax
import jax.numpy as jnp
from jax import lax
from jax.experimental import pallas as pl
from jax.experimental.pallas import tpu as pltpu


LANES = 128
SUBLANES = 8


def _chip_config():
    """Chip-aware (num_tensorcores, tile_rows).

    v7x: 2 TensorCores/chip + 3.2 TB/s HBM -> bigger tiles (4096 rows = 2 MiB
    per input per buffer) and a CORE_PARALLEL leading axis.  v5e/v6e: single
    TensorCore, 2048-row tiles (1 MiB per input per buffer; 2 inputs x 2
    buffers = 4 MiB, safely under v5e's 16 MiB scoped-VMEM default).
    """
    kind = ""
    try:
        kind = jax.devices()[0].device_kind.lower()
    except Exception:
        pass
    if ("v7" in kind) or ("tpu7" in kind) or ("tpu 7" in kind):
        return 2, 4096
    return 1, 2048


NUM_TENSORCORES, TR_TARGET = _chip_config()

if NUM_TENSORCORES > 1 and hasattr(pltpu, "CORE_PARALLEL"):
    _MULTICORE_SEMANTICS = (pltpu.CORE_PARALLEL, pltpu.ARBITRARY)
else:
    _MULTICORE_SEMANTICS = ("parallel", "arbitrary")
_SINGLECORE_SEMANTICS = ("arbitrary", "arbitrary")


def _make_masked_l1_kernel(rows: int, tr: int, tiles_per_core: int):
    """Kernel over lane-dense (tr, 128) tiles of the flattened element stream."""

    def kernel(pred_ref, targ_ref, out_ref, acc_ref):
        c = pl.program_id(0)
        i = pl.program_id(1)

        @pl.when(i == 0)
        def _():
            acc_ref[...] = jnp.zeros_like(acc_ref)

        p = pred_ref[...].astype(jnp.float32)
        t = targ_ref[...].astype(jnp.float32)

        # Positional row mask: the trailing block may be ragged (rows is not a
        # multiple of tr) or a clamped duplicate; such rows must contribute 0.
        start = (c * tiles_per_core + i) * tr
        row_in_tile = lax.broadcasted_iota(jnp.int32, (tr, LANES), 0)
        keep = jnp.logical_and(row_in_tile < rows - start,
                               jnp.logical_not(jnp.isnan(t)))
        # Reference zeroes both operands where the target is NaN, so the
        # difference there is exactly 0 (single fused select).
        absdiff = jnp.abs(jnp.where(keep, p - t, jnp.zeros_like(p)))

        # Fold (tr, 128) -> (8, 128) with pure VPU adds; sublane-aligned split
        # handles any row count (no cross-lane/sublane reduce needed).
        r8 = (tr // SUBLANES) * SUBLANES
        if r8:
            acc_ref[...] += absdiff[:r8].reshape(
                r8 // SUBLANES, SUBLANES, LANES).sum(axis=0)
        rem = tr - r8
        if rem:
            acc_ref[0:rem, :] += absdiff[r8:tr]

        @pl.when(i == pl.num_programs(1) - 1)
        def _():
            out_ref[0] = acc_ref[...]

    return kernel


def _tile_plan(rows: int):
    """Pick (tr, tiles_per_core, num_cores) for `rows` lane-dense rows."""
    rows = max(int(rows), 1)
    if rows <= TR_TARGET:
        # Single block; a block equal to the full row extent is always legal.
        return rows, 1, 1
    tiles_per_core = -(-rows // (NUM_TENSORCORES * TR_TARGET))
    return TR_TARGET, tiles_per_core, NUM_TENSORCORES


def _pallas_masked_l1_sum(pred_slab, targ_slab, rows: int):
    tr, tiles_per_core, num_cores = _tile_plan(rows)
    semantics = _MULTICORE_SEMANTICS if num_cores > 1 else _SINGLECORE_SEMANTICS
    # Clamp block indices so no block is entirely out of range; the kernel's
    # positional mask (computed from the *unclamped* grid position) zeroes any
    # duplicated rows such a clamp would re-read.
    last_block = (rows - 1) // tr

    def row_map(c, i):
        return (jnp.minimum(c * tiles_per_core + i, last_block), 0)

    partials = pl.pallas_call(
        _make_masked_l1_kernel(rows, tr, tiles_per_core),
        out_shape=jax.ShapeDtypeStruct((num_cores, SUBLANES, LANES), jnp.float32),
        grid_spec=pltpu.PrefetchScalarGridSpec(
            num_scalar_prefetch=0,
            grid=(num_cores, tiles_per_core),
            in_specs=[
                pl.BlockSpec((tr, LANES), row_map),
                pl.BlockSpec((tr, LANES), row_map),
            ],
            out_specs=pl.BlockSpec((1, SUBLANES, LANES), lambda c, i: (c, 0, 0)),
            scratch_shapes=[pltpu.VMEM((SUBLANES, LANES), jnp.float32)],
        ),
        compiler_params=pltpu.CompilerParams(dimension_semantics=semantics),
    )(pred_slab, targ_slab)
    # Tiny one-shot collapse of the per-core (8, 128) partial sums.
    return jnp.sum(partials)


def _to_slab(x):
    """Flatten to a lane-dense (rows, 128) slab (dtype preserved, e.g. bf16).

    Zero-copy (bitcast reshape) when the flat length is a multiple of 128;
    otherwise a single pad completes the last 128-lane row (padded zeros
    contribute |0 - 0| = 0).
    """
    flat = x.reshape(-1)
    n = flat.shape[0]
    rows = max(1, -(-n // LANES))
    pad = rows * LANES - n
    if pad:
        # TODO(synk): a fully copy-free ragged tail would need 1-D input blocks
        # (or a supported in-kernel (tr*128,)->(tr,128) reshape); keep the
        # single tail-row pad for the non-lane-aligned case.
        flat = jnp.pad(flat, (0, pad))
    return flat.reshape(rows, LANES), rows


def _masked_l1_sum_impl(predictions, targets):
    """sum(|pred * mask - nan_to_num(targ)|) for one [A, T, >=2] list element."""
    # [..., :2] is a zero-cost identity slice when the trailing dim is already 2.
    # TODO(synk): for wider trailing dims the slice materializes once; an
    # in-kernel column select would force a 2-lane layout, which is worse.
    pred = predictions[..., :2]
    targ = targets[..., :2]
    pred_slab, rows = _to_slab(pred)
    targ_slab, _ = _to_slab(targ)
    return _pallas_masked_l1_sum(pred_slab, targ_slab, rows)


_masked_l1_sum = jax.jit(_masked_l1_sum_impl)


@dataclass
class PredictionLossMetadata:
    """Detailed breakdown of the Prediction loss."""
    total_loss: jnp.ndarray
    l1_loss: jnp.ndarray


class PredictionLossFunctionPallas:
    """JAX/Pallas equivalent of the PyTorch PredictionLossFunction."""

    def __init__(self, l1_loss_weight: float) -> None:
        self._l1_loss_weight = float(l1_loss_weight)

    def __call__(self, predictions, targets):
        # The masked-L1 sum is linear in its elements, so summing per-element
        # kernel results is exact (up to float association) and removes the
        # torch.cat HBM copy entirely.
        l1_loss = jnp.zeros((), jnp.float32)
        for pred, targ in zip(predictions, targets):
            l1_loss = l1_loss + _masked_l1_sum(pred, targ)
        total_loss = l1_loss * self._l1_loss_weight
        return total_loss, PredictionLossMetadata(total_loss, l1_loss)


def _reference_loss(predictions, targets, weight):
    """Pure-JAX reference implementing the PyTorch semantics (f32 math)."""
    p = jnp.concatenate([x[..., :2] for x in predictions], 0).astype(jnp.float32)
    t = jnp.concatenate([x[..., :2] for x in targets], 0).astype(jnp.float32)
    mask = jnp.logical_not(jnp.isnan(t)).astype(p.dtype)
    t = jnp.nan_to_num(t, nan=0.0)
    p = p * mask
    l1 = jnp.sum(jnp.abs(p - t))
    return l1 * weight, l1


def _make_batch(key, batch, actors, T, D, dtype):
    preds, targs = [], []
    for _ in range(batch):
        key, k1, k2, k3 = jax.random.split(key, 4)
        p = jax.random.normal(k1, (actors, T, D), dtype=jnp.float32)
        t = jax.random.normal(k2, (actors, T, D), dtype=jnp.float32)
        nan_mask = jax.random.bernoulli(k3, 0.2, (actors, T, D))
        t = jnp.where(nan_mask, jnp.nan, t)
        preds.append(p.astype(dtype))
        targs.append(t.astype(dtype))
    return key, preds, targs


def _check(loss_fn, preds, targs, weight, rtol, atol):
    total, meta = loss_fn(preds, targs)
    total = jax.block_until_ready(total)
    ref_total, ref_l1 = _reference_loss(preds, targs, weight)
    assert jnp.allclose(total, ref_total, rtol=rtol, atol=atol), (total, ref_total)
    assert jnp.allclose(meta.l1_loss, ref_l1, rtol=rtol, atol=atol), (
        meta.l1_loss, ref_l1)


if __name__ == "__main__":
    key = jax.random.PRNGKey(0)
    l1_loss_weight = 0.5
    loss_fn = PredictionLossFunctionPallas(l1_loss_weight)

    # 1) Module-scale small case: batch=2 list elements of [4, 8, 2].
    key, preds, targs = _make_batch(key, 2, 4, 8, 2, jnp.float32)
    _check(loss_fn, preds, targs, l1_loss_weight, 1e-5, 1e-5)

    # 2) Multi-tile + ragged rows + real [..., :2] slice (D=3): exercises the
    #    in-kernel positional row mask and the vreg-aligned (8, 128) fold.
    key, preds, targs = _make_batch(key, 2, 4500, 30, 3, jnp.float32)
    _check(loss_fn, preds, targs, l1_loss_weight, 1e-4, 1e-2)

    # 3) bf16 inputs stay bf16 in HBM; the kernel upcasts and accumulates in f32.
    key, preds, targs = _make_batch(key, 2, 33, 7, 2, jnp.bfloat16)
    _check(loss_fn, preds, targs, l1_loss_weight, 1e-3, 1e-3)

    print("KERNEL_OK")
</pallas_src>

<mosaic_0001>
module attributes {stable_mosaic.version = 11 : i64} {
  func.func @kernel(%arg0: i32, %arg1: i32, %arg2: memref<1x128xf32, #tpu.memory_space<vmem>>, %arg3: memref<1x128xf32, #tpu.memory_space<vmem>>, %arg4: memref<1x8x128xf32, #tpu.memory_space<vmem>>, %arg5: memref<8x128xf32, #tpu.memory_space<vmem>>) attributes {dimension_semantics = [#tpu.dimension_semantics<arbitrary>, #tpu.dimension_semantics<arbitrary>], iteration_bounds = array<i64: 1, 1>, scalar_prefetch = 0 : i64, scratch_operands = 1 : i64, tpu.core_type = #tpu.core_type<tc>, window_params = [{transform_indices = @transform_0, window_bounds = array<i64: 1, 128>}, {transform_indices = @transform_1, window_bounds = array<i64: 1, 128>}, {transform_indices = @transform_2, window_bounds = array<i64: 1, 8, 128>}]} {
    %c0_i32 = arith.constant 0 : i32
    %0 = arith.cmpi eq, %arg1, %c0_i32 : i32
    %1 = arith.extui %0 : i1 to i32
    %c0_i32_0 = arith.constant 0 : i32
    %2 = arith.cmpi ne, %1, %c0_i32_0 : i32
    scf.if %2 {
      %cst_13 = arith.constant 0.000000e+00 : f32
      %25 = vector.broadcast %cst_13 : f32 to vector<8x128xf32>
      %c0_14 = arith.constant 0 : index
      %c0_15 = arith.constant 0 : index
      %26 = vector.load %arg5[%c0_14, %c0_15] : memref<8x128xf32, #tpu.memory_space<vmem>>, vector<8x128xf32>
      tpu.vector_store %arg5[%c0_14, %c0_15], %25 {strides = array<i32>} : memref<8x128xf32, #tpu.memory_space<vmem>>, vector<8x128xf32>,
    } else {
    }
    %c0 = arith.constant 0 : index
    %c0_1 = arith.constant 0 : index
    %3 = vector.load %arg2[%c0, %c0_1] : memref<1x128xf32, #tpu.memory_space<vmem>>, vector<1x128xf32>
    %c0_2 = arith.constant 0 : index
    %c0_3 = arith.constant 0 : index
    %4 = vector.load %arg3[%c0_2, %c0_3] : memref<1x128xf32, #tpu.memory_space<vmem>>, vector<1x128xf32>
    %c1_i32 = arith.constant 1 : i32
    %5 = arith.muli %arg0, %c1_i32 : i32
    %6 = arith.addi %5, %arg1 : i32
    %c1_i32_4 = arith.constant 1 : i32
    %7 = arith.muli %6, %c1_i32_4 : i32
    %8 = tpu.iota {dimensions = array<i32: 0>} : vector<1x128xi32>
    %c1_i32_5 = arith.constant 1 : i32
    %9 = arith.subi %c1_i32_5, %7 : i32
    %10 = vector.broadcast %9 : i32 to vector<1x128xi32>
    %11 = arith.cmpi slt, %8, %10 : vector<1x128xi32>
    %12 = arith.cmpf one, %4, %4 : vector<1x128xf32>
    %cst = arith.constant dense<true> : vector<1x128xi1>
    %13 = arith.xori %12, %cst : vector<1x128xi1>
    %14 = arith.andi %11, %13 : vector<1x128xi1>
    %15 = arith.subf %3, %4 : vector<1x128xf32>
    %cst_6 = arith.constant 0.000000e+00 : f32
    %16 = vector.broadcast %cst_6 : f32 to vector<1x128xf32>
    %17 = arith.select %14, %15, %16 : vector<1x128xi1>, vector<1x128xf32>
    %18 = math.absf %17 : vector<1x128xf32>
    %c0_7 = arith.constant 0 : index
    %c0_8 = arith.constant 0 : index
    %19 = vector.load %arg5[%c0_7, %c0_8] : memref<8x128xf32, #tpu.memory_space<vmem>>, vector<1x128xf32>
    %20 = arith.addf %19, %18 : vector<1x128xf32>
    %c0_9 = arith.constant 0 : index
    %c0_10 = arith.constant 0 : index
    %21 = vector.load %arg5[%c0_9, %c0_10] : memref<8x128xf32, #tpu.memory_space<vmem>>, vector<1x128xf32>
    tpu.vector_store %arg5[%c0_9, %c0_10], %20 {strides = array<i32>} : memref<8x128xf32, #tpu.memory_space<vmem>>, vector<1x128xf32>,
    %c0_i32_11 = arith.constant 0 : i32
    %22 = arith.cmpi eq, %arg1, %c0_i32_11 : i32
    %23 = arith.extui %22 : i1 to i32
    %c0_i32_12 = arith.constant 0 : i32
    %24 = arith.cmpi ne, %23, %c0_i32_12 : i32
    scf.if %24 {
      %c0_13 = arith.constant 0 : index
      %c0_14 = arith.constant 0 : index
      %25 = vector.load %arg5[%c0_13, %c0_14] : memref<8x128xf32, #tpu.memory_space<vmem>>, vector<8x128xf32>
      %c0_15 = arith.constant 0 : index
      %c0_16 = arith.constant 0 : index
      %c0_17 = arith.constant 0 : index
      %26 = vector.load %arg4[%c0_15, %c0_16, %c0_17] : memref<1x8x128xf32, #tpu.memory_space<vmem>>, vector<1x8x128xf32>
      %27 = vector.shape_cast %26 : vector<1x8x128xf32> to vector<8x128xf32>
      %28 = vector.shape_cast %25 : vector<8x128xf32> to vector<1x8x128xf32>
      tpu.vector_store %arg4[%c0_15, %c0_16, %c0_17], %28 {strides = array<i32>} : memref<1x8x128xf32, #tpu.memory_space<vmem>>, vector<1x8x128xf32>,
    } else {
    }
    return
  }
  func.func @transform_0(%arg0: i32, %arg1: i32) -> (i32, i32) {
    %c1_i32 = arith.constant 1 : i32
    %0 = arith.muli %arg0, %c1_i32 : i32
    %1 = arith.addi %0, %arg1 : i32
    %c0_i32 = arith.constant 0 : i32
    %2 = arith.minsi %1, %c0_i32 : i32
    %c0_i32_0 = arith.constant 0 : i32
    %c0_i32_1 = arith.constant 0 : i32
    return %2, %c0_i32_0 : i32, i32
  }
  func.func @transform_1(%arg0: i32, %arg1: i32) -> (i32, i32) {
    %c1_i32 = arith.constant 1 : i32
    %0 = arith.muli %arg0, %c1_i32 : i32
    %1 = arith.addi %0, %arg1 : i32
    %c0_i32 = arith.constant 0 : i32
    %2 = arith.minsi %1, %c0_i32 : i32
    %c0_i32_0 = arith.constant 0 : i32
    %c0_i32_1 = arith.constant 0 : i32
    return %2, %c0_i32_0 : i32, i32
  }
  func.func @transform_2(%arg0: i32, %arg1: i32) -> (i32, i32, i32) {
    %c0_i32 = arith.constant 0 : i32
    %c0_i32_0 = arith.constant 0 : i32
    %c0_i32_1 = arith.constant 0 : i32
    return %arg0, %c0_i32, %c0_i32_0 : i32, i32, i32
  }
}

</mosaic_0001>

<bundles_post_ra>
// kernel: _masked_l1_sum_impl.1
= control target key start
LH: loop header
LB: loop body
LE: loop exit
PB: predicated region body
PF: predicated region fallthrough
CT: control target
= control target key end

     0   :  { %v67_v0 = vlaneseq  ;;  %v98_v1 = vmov 0.0   ;;  %vm99_vm1 = vmmov 1   ;;  %s124_s0 = inlined_call_operand.vmem [shape: f32[1,128], index: 0, kind: input, shape index: {}]   ;;  %s125_s1 = inlined_call_operand.vmem [shape: f32[1,128], index: 1, kind: input, shape index: {}]   ;;  %s126_s2 = inlined_call_operand.vmem [shape: f32[1,8,128], index: 2, kind: output, shape index: {}]  }
   0x1   :  { %63 = vst [vmem:[#allocation2] sm:$0xff] %v98_v1  ;;  %v64_v2 = vld [vmem:[%s124_s0] sm:$0x1] }
   0x2   :  { %v65_v3 = vld [vmem:[%s125_s1] sm:$0x1]  ;;  %v68_v4 = vshrl.u32 %v67_v0, 7 }
   0x3   :  { %vm72_vm0 = vcmp.ne.f32.partialorder %v65_v3, %v65_v3  ;;  %v75_v5 = vsub.f32 %v64_v2, %v65_v3 }
   0x4   :  { %vm73_vm2 = vmxor %vm72_vm0, %vm99_vm1  ;;  %vm71_vm3 = vcmp.lt.s32.totalorder %v68_v4, 1 }
   0x5   :  { %vm74_vm4 = vmand %vm71_vm3, %vm73_vm2 }
   0x6   :  { %v76_v6 = vsel %vm74_vm4, %v75_v5, 0.0 }
   0x7   :  { %v77_v7 = vand.u32 2147483647, %v76_v6 }
   0x8   :  { %v78_v8 = vld [vmem:[#allocation2] sm:$0x1] }
   0x9   :  { %v79_v9 = vadd.f32 %v78_v8, %v77_v7 }
   0xb   :  { %80 = vst [vmem:[#allocation2] sm:$0x1] %v79_v9 }
  0x12   :  { %v84_v10 = vld [vmem:[#allocation2] sm:$0xff] }
  0x13   :  { %85 = vst [vmem:[%s126_s2] sm:$0xff] %v84_v10 }

</bundles_post_ra>
